<compile_context>
chip_gen: v5e
topology: v5e:2x2
jax: 0.10.0
libtpu: 0.0.40
codegen_flags: <defaults>
</compile_context>

<pallas_src>
from typing import Optional, Sequence

import jax
import jax.numpy as jnp
from jax.experimental import pallas as pl
from jax.experimental.pallas import tpu as pltpu


def _copy_kernel(x_hbm, o_hbm, sem):
    # One whole-array HBM->HBM DMA: read N bytes + write N bytes, nothing else.
    copy = pltpu.make_async_copy(x_hbm, o_hbm, sem)
    copy.start()
    copy.wait()


@jax.jit
def _materialize_copy(arg: jax.Array) -> jax.Array:
    """Fresh-buffer pass-through of `arg` via a single grid-less HBM->HBM DMA."""
    nbytes = int(arg.size) * jnp.dtype(arg.dtype).itemsize
    return pl.pallas_call(
        _copy_kernel,
        out_shape=jax.ShapeDtypeStruct(arg.shape, arg.dtype),
        in_specs=[pl.BlockSpec(memory_space=pl.ANY)],   # raw HBM ref, no auto-DMA
        out_specs=pl.BlockSpec(memory_space=pl.ANY),    # raw HBM ref, no auto-DMA
        scratch_shapes=[pltpu.SemaphoreType.DMA],
        # Pure memory traffic: N bytes read + N bytes written, zero flops.
        cost_estimate=pl.CostEstimate(
            flops=0, transcendentals=0, bytes_accessed=2 * nbytes
        ),
    )(arg)


class Factor:
    """JAX/Pallas port of logic_crf.core.Factor (abstract base factor)."""

    def __init__(self, shape, names: Sequence, mapping: Optional[Sequence] = None):
        self.names = names
        self.mapping = mapping
        self.shape = shape

    def __repr__(self):
        return "{}({})".format(
            self.__class__.__name__, ", ".join(map(str, self.names))
        )

    def clone(self):
        raise NotImplementedError()

    def permute(self, names):
        raise NotImplementedError()

    def align_to(self, names):
        return self.permute(names)

    def factorize(self):
        return [self]

    def forward(self, arg: jax.Array, materialize: bool = False, **kwargs) -> jax.Array:
        # TODO(synk): PyTorch base-class forward is `pass` (returns None); the
        # zero-cost pass-through `return arg` stands in as the data-path hook.
        # `materialize=True` runs the Pallas DMA copy to produce a fresh buffer
        # (the scaffold concrete subclasses would replace with real compute).
        if materialize:
            return _materialize_copy(arg)
        return arg

    def __call__(self, arg, **kwargs):
        return self.forward(arg, **kwargs)


if __name__ == "__main__":
    key = jax.random.PRNGKey(0)
    # Small NCHW tensor consistent with how a Factor subclass would be fed.
    B, C, H, W = 2, 4, 16, 16
    x = jax.random.normal(key, (B, C, H, W), dtype=jnp.float32)

    factor = Factor(shape=(B, C, H, W), names=("b", "c", "h", "w"), mapping=None)

    # Default forward: zero-cost pass-through (review item #1 — no kernel launch).
    y_fast = factor(x)

    # Explicit materializing hook: runs the Pallas DMA copy kernel once.
    y = jax.block_until_ready(factor(x, materialize=True))

    assert y.shape == x.shape and y.dtype == x.dtype
    assert bool(jnp.allclose(y, x))
    assert bool(jnp.allclose(y_fast, x))
    print("KERNEL_OK")
</pallas_src>

<mosaic_0001>
module attributes {stable_mosaic.version = 11 : i64} {
  func.func @_copy_kernel(%arg0: memref<2x4x16x16xf32, #tpu.memory_space<any>>, %arg1: memref<2x4x16x16xf32, #tpu.memory_space<any>>, %arg2: memref<!tpu.dma_semaphore, #tpu.memory_space<semaphore_mem>>) attributes {dimension_semantics = [], scalar_prefetch = 0 : i64, scratch_operands = 1 : i64, tpu.core_type = #tpu.core_type<tc>} {
    tpu.enqueue_dma source(%arg0 : memref<2x4x16x16xf32, #tpu.memory_space<any>>) target(%arg1 : memref<2x4x16x16xf32, #tpu.memory_space<any>>) target_semaphore(%arg2 : memref<!tpu.dma_semaphore, #tpu.memory_space<semaphore_mem>>)
    tpu.wait_dma2 semaphore(%arg2 : memref<!tpu.dma_semaphore, #tpu.memory_space<semaphore_mem>>) src(%arg0 : memref<2x4x16x16xf32, #tpu.memory_space<any>>) dst(%arg1 : memref<2x4x16x16xf32, #tpu.memory_space<any>>)
    return
  }
}

</mosaic_0001>

<bundles_post_ra>
// kernel: _materialize_copy.1
= control target key start
LH: loop header
LB: loop body
LE: loop exit
PB: predicated region body
PF: predicated region fallthrough
CT: control target
= control target key end

     0   :  { %s34_s12 = smov [#allocation2]   ;;  %s35_s13 = smov [#allocation3]   ;;  %s53_s0 = inlined_call_operand.hbm [shape: f32[2,4,16,16], index: 0, kind: input, shape index: {}]   ;;  %s54_s1 = inlined_call_operand.hbm [shape: f32[2,4,16,16], index: 1, kind: output, shape index: {}]  }
   0x1   :  { %s10_s8 = sshll.u32 %s53_s0, 4  ;;  %s12_s11 = sshll.u32 %s54_s1, 4  ;;  %s11_s8 = int_to_ptr.hbm [resolvable:$true] %s10_s8  ;;  %s13_s11 = int_to_ptr.hbm [resolvable:$true] %s12_s11 }
   0x2   :  { %s36_s14 = smov 0  }
   0x3   :  { %16 = dma.general %s11_s8, 2048, %s13_s11, %s34_s12, %s35_s13, [#allocation4], %s36_s14, 0  }
   0x4   :  { %32 = dma.done.wait [#allocation2], 2048 }
   0x5   :  { %33 = vsyncadd [#allocation2], 4294965248 }
   0x6   :  { %22 = vsyncmov [#allocation2] }
   0x9   :  { %s23_s15 = vpop.sfrf %22 }
   0xa   :  { %p28_p0 = scmp.ne.s32.totalorder %s23_s15, 0 }
   0xc   :  { %27 = shalt.err (%p28_p0)  }

</bundles_post_ra>
